<compile_context>
chip_gen: v7x
topology: tpu7x:2x2x1
jax: 0.10.0
libtpu: 0.0.40
codegen_flags: <defaults>
</compile_context>

<pallas_src>
import functools

import numpy as np
import jax
import jax.numpy as jnp
from jax import lax
from jax.experimental import pallas as pl
from jax.experimental.pallas import tpu as pltpu


def _round_up(n, m):
    return ((n + m - 1) // m) * m


@functools.lru_cache(maxsize=None)
def _tap_offsets_and_masks(H, W):
    """Flattened-index offsets (dy*W + dx) and border-validity masks for the 9 taps of
    a 3x3 / pad=1 convolution on an (H, W) image flattened to H*W lanes."""
    p = np.arange(H * W)
    h, w = p // W, p % W
    offsets, masks = [], []
    for dy in (-1, 0, 1):
        for dx in (-1, 0, 1):
            offsets.append(dy * W + dx)
            valid = (h + dy >= 0) & (h + dy < H) & (w + dx >= 0) & (w + dx < W)
            masks.append(valid.astype(np.float32))
    return tuple(offsets), np.stack(masks)[:, None, :]  # (9, 1, H*W) float32


@functools.lru_cache(maxsize=None)
def _roll_matches_numpy():
    """pltpu.roll is documented to follow jnp.roll (out[i] = in[(i - shift) % n]).
    Probe the convention once on the SAME backend / compile path as the main kernel
    (a compiled pallas_call on the default TPU backend) so the static tap shifts are
    correct under either convention / jax version."""
    def probe(x_ref, o_ref):
        o_ref[...] = pltpu.roll(x_ref[...], shift=1, axis=1)

    x = jnp.tile(jnp.arange(128, dtype=jnp.float32)[None, :], (8, 1))
    y = pl.pallas_call(
        probe, out_shape=jax.ShapeDtypeStruct((8, 128), jnp.float32))(x)
    return bool(jnp.isclose(y[0, 0], 127.0))


def _pick_block_b(B, HW):
    """Largest divisor of B such that per-step lane width ~<= 8*256 and the grid stays
    >= 2 when B >= 2 (v7x has two TensorCores)."""
    target_lanes = 8 * 256
    best = 1
    for bb in range(1, B + 1):
        if B % bb:
            continue
        if bb * HW <= max(HW, target_lanes) and (B // bb >= 2 or B == 1):
            best = bb
    return best


def _make_kernel(cin_p, cout, cout_p, shifts):
    """Build the ConvDruCell kernel for static (cin_p, Cout, cout_p, shifts)."""

    def kernel(x_ref, h_ref, wzr_ref, bzr_ref, wh_ref, bh_ref, mask_ref,
               out_ref, stack_ref):
        # x_ref    : (cin_p, N)            N = block_b*HW; padded channel rows are 0
        # h_ref    : (Cout, N)             previous hidden state
        # wzr_ref  : (cout_p+cin_p, 9*cin_p)  fused update+reset gate conv weights
        # bzr_ref  : (cout_p+cin_p, 1)
        # wh_ref   : (Cout, 9*cin_p), bh_ref: (Cout, 1)   backbone conv
        # mask_ref : (9, 1, N)             per-tap border masks (tiled per image)
        # out_ref  : (Cout, N)
        # stack_ref: (9*cin_p, N) VMEM scratch -- im2col operand, fully overwritten
        #            with 8-row-aligned slab stores before each use.

        x = x_ref[...]                                   # (cin_p, N)

        # Hoist mask loads once per grid step; reused by both im2col builds.
        masks = {k: mask_ref[k] for k, s in enumerate(shifts) if s != 0}  # (1, N)

        def build_taps(plane):                           # plane: (cin_p, N)
            for k, s in enumerate(shifts):
                if s == 0:
                    tap = plane                          # center tap: mask all-ones
                else:
                    tap = pltpu.roll(plane, shift=s, axis=1) * masks[k]
                stack_ref[k * cin_p:(k + 1) * cin_p, :] = tap   # full 8-row slabs

        # Fused update + reset gate convolution: ONE matmul for the whole block.
        build_taps(x)
        zr = jax.nn.sigmoid(
            jnp.dot(wzr_ref[...], stack_ref[...],
                    preferred_element_type=jnp.float32) + bzr_ref[...])
        z = zr[:cout]                                    # update gate (Cout, N)
        r = zr[cout_p:]                                  # reset gate  (cin_p, N);
        #                                                  padded rows * x(=0) -> 0

        # Backbone convolution on r*x: second (and last) matmul.
        build_taps(r * x)
        h_new = jnp.tanh(
            jnp.dot(wh_ref[...], stack_ref[...],
                    preferred_element_type=jnp.float32) + bh_ref[...])

        # Gating: out = (1 - z) * h_new + hidden * z     (lane-dense store)
        out_ref[...] = (1.0 - z) * h_new + h_ref[...] * z

    return kernel


@functools.partial(jax.jit, static_argnames=("block_b", "shifts"))
def _conv_dru_impl(x, hidden, wz, bz, wr, br, wh, bh, *, block_b, shifts):
    B, Cin, H, W = x.shape
    Cout = wz.shape[0]
    HW = H * W
    N = B * HW
    NB = block_b * HW
    cin_p = _round_up(Cin, 8)
    cout_p = _round_up(Cout, 8)

    # NCHW -> channel-major, batch folded into lanes: (C, B*HW), channels padded to 8k.
    x2 = jnp.transpose(x.astype(jnp.float32), (1, 0, 2, 3)).reshape(Cin, N)
    x2 = jnp.pad(x2, ((0, cin_p - Cin), (0, 0)))
    h2 = jnp.transpose(hidden.astype(jnp.float32), (1, 0, 2, 3)).reshape(Cout, N)

    # NOTE: if this cell is used inside a scan/unrolled RNN, hoist the weight packing
    # below out of the per-timestep call (it only depends on the parameters).
    def pack_w(w):
        # PyTorch (Co, Ci, 3, 3) -> (Co, 9*cin_p), tap-major, tap slots zero-padded.
        co, ci = w.shape[0], w.shape[1]
        wt = jnp.transpose(w.astype(jnp.float32).reshape(co, ci, 9), (0, 2, 1))
        wt = jnp.pad(wt, ((0, 0), (0, 0), (0, cin_p - ci)))
        return wt.reshape(co, 9 * cin_p)

    wz_p = pack_w(wz)                                            # (Cout, 9*cin_p)
    wr_p = jnp.pad(pack_w(wr), ((0, cin_p - Cin), (0, 0)))       # (cin_p, 9*cin_p)
    wh_p = pack_w(wh)                                            # (Cout, 9*cin_p)
    # Fused z/r weight; z rows padded to cout_p so the r slice is sublane-aligned.
    wzr = jnp.concatenate(
        [jnp.pad(wz_p, ((0, cout_p - Cout), (0, 0))), wr_p], axis=0)
    bzr = jnp.concatenate(
        [jnp.pad(bz.astype(jnp.float32), (0, cout_p - Cout)),
         jnp.pad(br.astype(jnp.float32), (0, cin_p - Cin))]).reshape(cout_p + cin_p, 1)
    bh2 = bh.astype(jnp.float32).reshape(Cout, 1)

    # Per-image tap masks tiled across the block_b images sharing one grid step.
    masks = jnp.tile(jnp.asarray(_tap_offsets_and_masks(H, W)[1]),
                     (1, 1, block_b))                            # (9, 1, NB)

    kernel = _make_kernel(cin_p, Cout, cout_p, shifts)

    out2 = pl.pallas_call(
        kernel,
        out_shape=jax.ShapeDtypeStruct((Cout, N), jnp.float32),
        grid_spec=pltpu.PrefetchScalarGridSpec(
            num_scalar_prefetch=0,
            grid=(B // block_b,),
            in_specs=[
                pl.BlockSpec((cin_p, NB), lambda b: (0, b)),
                pl.BlockSpec((Cout, NB), lambda b: (0, b)),
                pl.BlockSpec((cout_p + cin_p, 9 * cin_p), lambda b: (0, 0)),
                pl.BlockSpec((cout_p + cin_p, 1), lambda b: (0, 0)),
                pl.BlockSpec((Cout, 9 * cin_p), lambda b: (0, 0)),
                pl.BlockSpec((Cout, 1), lambda b: (0, 0)),
                pl.BlockSpec((9, 1, NB), lambda b: (0, 0, 0)),
            ],
            out_specs=pl.BlockSpec((Cout, NB), lambda b: (0, b)),
            scratch_shapes=[pltpu.VMEM((9 * cin_p, NB), jnp.float32)],
        ),
        compiler_params=pltpu.CompilerParams(
            dimension_semantics=("parallel",)),
    )(x2, h2, wzr, bzr, wh_p, bh2, masks)

    # (Cout, B*HW) -> (B, Cout, H, W)
    return jnp.transpose(out2.reshape(Cout, B, H, W), (1, 0, 2, 3))


def conv_dru_cell(x, hidden, wz, bz, wr, br, wh, bh, *, block_b=None):
    """ConvDruCell forward.

    x:      (B, Cin, H, W)   NCHW, as in PyTorch
    hidden: (B, Cout, H, W)
    wz, wh: (Cout, Cin, 3, 3); bz, bh: (Cout,)
    wr:     (Cin,  Cin, 3, 3); br:     (Cin,)
    Returns (out, out), each (B, Cout, H, W) -- matching the PyTorch module.
    """
    B, _, H, W = x.shape
    HW = H * W
    if block_b is None:
        block_b = _pick_block_b(B, HW)
    assert B % block_b == 0, "block_b must divide the batch size"

    offsets, _ = _tap_offsets_and_masks(H, W)
    N = block_b * HW
    sign = -1 if _roll_matches_numpy() else 1
    # shift s such that roll(plane, s)[p] == plane[(p + d) % N] for each tap offset d.
    shifts = tuple((sign * d) % N for d in offsets)

    out = _conv_dru_impl(x, hidden, wz, bz, wr, br, wh, bh,
                         block_b=block_b, shifts=shifts)
    return out, out


def _conv_dru_reference(x, hidden, wz, bz, wr, br, wh, bh):
    """Pure-JAX (lax.conv) reference in NCHW, mirroring the PyTorch module."""
    def conv(inp, w, b):
        y = lax.conv_general_dilated(
            inp, w, window_strides=(1, 1), padding=((1, 1), (1, 1)),
            dimension_numbers=("NCHW", "OIHW", "NCHW"))
        return y + b[None, :, None, None]

    z = jax.nn.sigmoid(conv(x, wz, bz))
    r = jax.nn.sigmoid(conv(x, wr, br))
    h_ = jnp.tanh(conv(r * x, wh, bh))
    return (1.0 - z) * h_ + hidden * z


if __name__ == "__main__":
    B, Cin, Cout, H, W = 2, 4, 8, 16, 16

    key = jax.random.PRNGKey(0)
    kx, kh, k1, k2, k3, k4, k5, k6 = jax.random.split(key, 8)

    x = jax.random.normal(kx, (B, Cin, H, W), jnp.float32)
    hidden = jax.random.normal(kh, (B, Cout, H, W), jnp.float32)

    scale = 0.2
    wz = scale * jax.random.normal(k1, (Cout, Cin, 3, 3), jnp.float32)
    bz = scale * jax.random.normal(k2, (Cout,), jnp.float32)
    wr = scale * jax.random.normal(k3, (Cin, Cin, 3, 3), jnp.float32)
    br = scale * jax.random.normal(k4, (Cin,), jnp.float32)
    wh = scale * jax.random.normal(k5, (Cout, Cin, 3, 3), jnp.float32)
    bh = scale * jax.random.normal(k6, (Cout,), jnp.float32)

    out, out_again = conv_dru_cell(x, hidden, wz, bz, wr, br, wh, bh)
    out = jax.block_until_ready(out)

    ref = jax.block_until_ready(
        _conv_dru_reference(x, hidden, wz, bz, wr, br, wh, bh))

    assert out.shape == (B, Cout, H, W)
    assert out_again.shape == (B, Cout, H, W)
    max_err = float(jnp.max(jnp.abs(out - ref)))
    assert jnp.allclose(out, ref, atol=1e-4, rtol=1e-4), max_err

    # Second check: multiple images folded into one grid step (block_b=4, grid=2),
    # exercising the cross-image border masking in the lane-folded layout.
    B2 = 8
    kx2, kh2 = jax.random.split(jax.random.PRNGKey(1), 2)
    xb = jax.random.normal(kx2, (B2, Cin, H, W), jnp.float32)
    hb = jax.random.normal(kh2, (B2, Cout, H, W), jnp.float32)
    out_b, _ = conv_dru_cell(xb, hb, wz, bz, wr, br, wh, bh, block_b=4)
    out_b = jax.block_until_ready(out_b)
    ref_b = jax.block_until_ready(
        _conv_dru_reference(xb, hb, wz, bz, wr, br, wh, bh))
    max_err_b = float(jnp.max(jnp.abs(out_b - ref_b)))
    assert jnp.allclose(out_b, ref_b, atol=1e-4, rtol=1e-4), max_err_b

    print("KERNEL_OK")
</pallas_src>

<mosaic_0001>
module attributes {stable_mosaic.version = 11 : i64} {
  func.func @probe(%arg0: memref<8x128xf32, #tpu.memory_space<vmem>>, %arg1: memref<8x128xf32, #tpu.memory_space<vmem>>) attributes {dimension_semantics = [], scalar_prefetch = 0 : i64, scratch_operands = 0 : i64, tpu.core_type = #tpu.core_type<tc>} {
    %c0 = arith.constant 0 : index
    %c0_0 = arith.constant 0 : index
    %0 = vector.load %arg0[%c0, %c0_0] : memref<8x128xf32, #tpu.memory_space<vmem>>, vector<8x128xf32>
    %c1_i32 = arith.constant 1 : i32
    %1 = tpu.dynamic_rotate %0 by %c1_i32 dim 1 : vector<8x128xf32>, i32 -> vector<8x128xf32>
    %c0_1 = arith.constant 0 : index
    %c0_2 = arith.constant 0 : index
    %2 = vector.load %arg1[%c0_1, %c0_2] : memref<8x128xf32, #tpu.memory_space<vmem>>, vector<8x128xf32>
    tpu.vector_store %arg1[%c0_1, %c0_2], %1 {strides = array<i32>} : memref<8x128xf32, #tpu.memory_space<vmem>>, vector<8x128xf32>,
    return
  }
}

</mosaic_0001>

<bundles_post_ra>
// kernel: tpu_custom_call.1
= control target key start
LH: loop header
LB: loop body
LE: loop exit
PB: predicated region body
PF: predicated region fallthrough
CT: control target
= control target key end

     0   :  { %6 = vsyncpa [#allocation3], 0  ;;  %s128_s0 = inlined_call_operand.hbm [shape: f32[8,128], index: 0, kind: input, shape index: {}]   ;;  %s129_s1 = inlined_call_operand.hbm [shape: f32[8,128], index: 1, kind: output, shape index: {}]  }
   0x1   :  { %7 = vsyncpa [#allocation4], 0  ;;  %s91_s6 = smov [#allocation2]   ;;  %s43_s10 = scalar_lea.hbm %s128_s0, 128 }
   0x2   :  { %s14_s7 = sshll.u32 %s91_s6, 4  ;;  %p44_p0 = scmp.ne.s32.totalorder %s128_s0, %s43_s10  ;;  %s15_s7 = int_to_ptr.vmem [resolvable:$true] %s14_s7 }
   0x3   :  { %p47_p1 = scmp.lt.u32.totalorder %s43_s10, %s128_s0 }
   0x5   :  { %p49_p2 = pnand %p47_p1, %p44_p0 }
   0x7   :  { %52 = shalt.err (!%p49_p2)
}
   0x8   :  { %s53_s15 = scalar_lea.vmem %s15_s7, 128  ;;  %p58_p4 = scmp.lt.s32.totalorder %s15_s7, %s15_s7 }
   0x9   :  { %p54_p3 = scmp.ne.s32.totalorder %s15_s7, %s53_s15  ;;  %p59_p5 = scmp.lt.s32.totalorder %s53_s15, %s53_s15 }
   0xb   :  { %p60_p6 = por %p59_p5, %p58_p4 }
   0xd   :  { %p61_p7 = pnand %p60_p6, %p54_p3 }
   0xf   :  { %64 = shalt.err (!%p61_p7)
}
  0x10   :  { %17 = dma.hbm_to_vmem [thread:$0]  %s128_s0, 128, %s15_s7, [#allocation3]  }
  0x11   :  { %87 = dma.done.wait [#allocation3], 128  }
  0x12   :  { %88 = vsyncadd [#allocation3], 4294967168  ;;  %v21_v0 = vld [vmem:[#allocation2] sm:$0xff]  ;;  %s92_s18 = smov 1   ;;  %s93_s19 = smov [#allocation5]  }
  0x13   :  { %22 = vrot.lane.b32.xlu0 %v21_v0, %s92_s18  ;;  %s31_s20 = sshll.u32 %s93_s19, 4  ;;  %s32_s20 = int_to_ptr.vmem [resolvable:$true] %s31_s20 }
  0x14   :  { %s65_s21 = scalar_lea.vmem %s32_s20, 128  ;;  %p70_p9 = scmp.lt.s32.totalorder %s32_s20, %s32_s20 }
  0x15   :  { %p66_p8 = scmp.ne.s32.totalorder %s32_s20, %s65_s21  ;;  %p71_p10 = scmp.lt.s32.totalorder %s65_s21, %s65_s21 }
  0x17   :  { %p72_p11 = por %p71_p10, %p70_p9 }
  0x19   :  { %p73_p12 = pnand %p72_p11, %p66_p8 }
  0x85   :  { %v23_v1 = vpop.permute.xlu0 %22 }
  0x86   :  { %24 = vst [vmem:[#allocation5] sm:$0xff] %v23_v1 }
  0x87   :  { %76 = shalt.err (!%p73_p12)
}
  0x88   :  { %s77_s0 = scalar_lea.hbm %s129_s1, 128 }
  0x89   :  { %p78_p13 = scmp.ne.s32.totalorder %s129_s1, %s77_s0  ;;  %p81_p0 = scmp.lt.u32.totalorder %s77_s0, %s129_s1 }
  0x8b   :  { %p83_p1 = pnand %p81_p0, %p78_p13 }
  0x8d   :  { %86 = shalt.err (!%p83_p1)
}
  0x8e   :  { %34 = dma.vmem_to_hbm [thread:$0]  %s32_s20, 128, %s129_s1, [#allocation4]  }
  0x8f   :  { %89 = dma.done.wait [#allocation4], 128  }
  0x90   :  { %90 = vsyncadd [#allocation4], 4294967168 }
  0x91   :  { %38 = vsyncpa [#allocation3], 1 }
  0x92   :  { %39 = vsyncpa [#allocation4], 1 }

</bundles_post_ra>
